<compile_context>
chip_gen: v7x
topology: tpu7x:2x2x1
jax: 0.10.0
libtpu: 0.0.40
codegen_flags: <defaults>
</compile_context>

<pallas_src>
import jax
import jax.numpy as jnp
from jax.experimental import pallas as pl
from jax.experimental.pallas import tpu as pltpu


# ------------------------------ kernel helpers ------------------------------ #

def _lane_tile(block, reps):
    """Replicate a (rows, L) block `reps` times along the minor (lane) axis.

    Pairwise (doubling) concatenation keeps most concats on 128-lane-aligned
    operands; all copies are identical so ordering is irrelevant.
    """
    if reps <= 1:
        return block
    out = block
    r = 1
    while 2 * r <= reps:
        out = jnp.concatenate([out, out], axis=-1)
        r *= 2
    if r < reps:
        out = jnp.concatenate([out] + [block] * (reps - r), axis=-1)
    return out


# ------------------------------ Pallas kernel ------------------------------ #

def discriminator_fused_kernel(x_ref, w1_ref, b1_ref, w2_ref, b2_ref,
                               w3_ref, b3_ref, o_ref):
    # x_ref : (bn, nc*S)  f32  -- x[n, c, s] at column c*S + s (free reshape of NCDHW)
    # w1_ref: (nc, ndf*S) f32  -- [c, ci*S + s] = w1[ci, c]   (ci-major, s-minor)
    # b1_ref: (1, ndf*S)  f32  -- [0, ci*S + s] = b1[ci]
    # w2_ref: (ndf*S, ndf) bf16 -- row ci*S + s holds w2[co, ci, d, h, w], s = d*16+h*4+w
    # b2_ref: (1, ndf) f32   w3_ref: (ndf, 1) bf16   b3_ref: (1, 1) f32   o_ref: (bn, 1) f32
    nc = w1_ref.shape[0]
    L, ndf = w2_ref.shape              # L = ndf * S  (ci-major, s-minor flattening)
    S = L // ndf

    x = x_ref[...]                     # (bn, nc*S), stays in VMEM/vregs
    w1 = w1_ref[...]                   # (nc, L)

    # -- from_rgb_block: gdrop(0.0)=identity; 1x1x1 conv as nc unrolled VPU
    #    FMAs on the in-kernel lane-replicated x; then LeakyReLU(0.2). -------
    y = None
    for c in range(nc):                            # nc = 4: static unroll, pure VPU
        xc = x[:, c * S:(c + 1) * S]               # (bn, S)
        xc_rep = _lane_tile(xc, ndf)               # (bn, ndf*S): ndf copies, ci-major
        term = xc_rep * w1[c:c + 1, :]             # (1, L) row sublane-broadcasts for free
        y = term if y is None else y + term
    y = y + b1_ref[...]
    y = jnp.where(y >= 0, y, 0.2 * y)              # (bn, ndf*S) f32, never leaves VMEM

    # -- last_block: 4^3 valid conv == one (bn, L) @ (L, ndf) MXU matmul -----
    #    bf16 operands, f32 accumulation; then LeakyReLU(0.2).
    z = jnp.dot(y.astype(w2_ref.dtype), w2_ref[...],
                preferred_element_type=jnp.float32) + b2_ref[...]
    z = jnp.where(z >= 0, z, 0.2 * z)              # (bn, ndf) f32

    # Flatten is a no-op (conv output spatial dims are 1^3); Linear(ndf,1) + Sigmoid.
    logit = jnp.dot(z.astype(w3_ref.dtype), w3_ref[...],
                    preferred_element_type=jnp.float32) + b3_ref[...]
    e = jnp.exp(-jnp.abs(logit))                   # numerically stable sigmoid
    o_ref[...] = jnp.where(logit >= 0, 1.0 / (1.0 + e), e / (1.0 + e))


# --------------------- one-time weight layout packing ----------------------- #

def pack_params(params, *, mxu_dtype=jnp.bfloat16):
    """Precompute all kernel-side weight layouts ONCE (hoisted out of forward).

    Flattening order of the (ci, s) pair is ci-major / s-minor (index = ci*S+s),
    which lets the kernel replicate x by simple lane tiling (no jnp.repeat).
    """
    w1, b1, w2, b2, w3, b3 = (params[k] for k in ("w1", "b1", "w2", "b2", "w3", "b3"))
    ndf, nc = w1.shape[0], w1.shape[1]
    kd, kh, kw = w2.shape[2], w2.shape[3], w2.shape[4]
    S = kd * kh * kw

    w1t = w1.reshape(ndf, nc).T                                   # (nc, ndf)
    w1_tiled = jnp.repeat(w1t, S, axis=1)                         # (nc, ndf*S): [c, ci*S+s] = w1t[c, ci]
    b1_tiled = jnp.repeat(b1, S).reshape(1, ndf * S)              # [0, ci*S+s] = b1[ci]
    # conv2 weight (co, ci, 4,4,4) -> (ndf*S, ndf), row order (ci-major, s-minor)
    w2r = jnp.transpose(w2, (1, 2, 3, 4, 0)).reshape(ndf * S, ndf)
    return dict(
        w1_tiled=w1_tiled.astype(jnp.float32),      # VPU operand: keep f32 (v5e)
        b1_tiled=b1_tiled.astype(jnp.float32),
        w2r=w2r.astype(mxu_dtype),                  # MXU operand: bf16 halves DMA + MXU passes
        b2r=b2.reshape(1, ndf).astype(jnp.float32),
        w3t=w3.T.astype(mxu_dtype),                 # (ndf, 1) MXU operand
        b3r=b3.reshape(1, 1).astype(jnp.float32),
    )


# ------------------------------ forward wrapper ------------------------------ #

@jax.jit
def discriminator_forward(x, packed):
    N, nc, D, H, W = x.shape
    S = D * H * W
    L, ndf = packed["w2r"].shape                    # L = ndf * S

    # Free, contiguous reshape only -- no transpose, no repeat, no extra HLO
    # data movement: column index is c*S + s, exactly what the kernel expects.
    x2d = x.reshape(N, nc * S)

    # Batch-block size: tile very large batches (amortizes per-step overhead,
    # fills sublanes); tiny batches are a single block (grid of 1).
    bn = N
    for cand in (256, 128, 64, 32, 16, 8):
        if N % cand == 0:
            bn = cand
            break
    grid = (N // bn,)

    flops = 2 * N * S * nc * ndf + 2 * N * (S * ndf) * ndf + 2 * N * ndf
    weight_bytes = sum(int(v.size) * v.dtype.itemsize for v in packed.values())
    bytes_accessed = int(x2d.size) * x2d.dtype.itemsize + weight_bytes + N * 4

    out = pl.pallas_call(
        discriminator_fused_kernel,
        out_shape=jax.ShapeDtypeStruct((N, 1), jnp.float32),
        grid=grid,
        in_specs=[
            pl.BlockSpec((bn, nc * S), lambda i: (i, 0)),   # x: blocked over batch
            pl.BlockSpec((nc, L),      lambda i: (0, 0)),   # weights: constant index_map
            pl.BlockSpec((1, L),       lambda i: (0, 0)),   #  -> DMA'd once, VMEM-resident
            pl.BlockSpec((L, ndf),     lambda i: (0, 0)),
            pl.BlockSpec((1, ndf),     lambda i: (0, 0)),
            pl.BlockSpec((ndf, 1),     lambda i: (0, 0)),
            pl.BlockSpec((1, 1),       lambda i: (0, 0)),
        ],
        out_specs=pl.BlockSpec((bn, 1), lambda i: (i, 0)),
        compiler_params=pltpu.CompilerParams(
            dimension_semantics=("parallel",)),             # shards batch blocks on v7x's 2 TCs
        cost_estimate=pl.CostEstimate(flops=flops, transcendentals=N,
                                      bytes_accessed=bytes_accessed),
    )(x2d, packed["w1_tiled"], packed["b1_tiled"], packed["w2r"],
      packed["b2r"], packed["w3t"], packed["b3r"])
    return out


# --------------------------- params & pure-JAX ref --------------------------- #

def init_params(key, nc, ndf):
    ks = jax.random.split(key, 6)
    # shapes exactly as in nn.Conv3d / nn.Linear of the module
    w1 = jax.random.normal(ks[0], (ndf, nc, 1, 1, 1), jnp.float32) * 0.2
    b1 = jax.random.normal(ks[1], (ndf,), jnp.float32) * 0.1
    w2 = jax.random.normal(ks[2], (ndf, ndf, 4, 4, 4), jnp.float32) * (1.0 / (ndf * 64) ** 0.5)
    b2 = jax.random.normal(ks[3], (ndf,), jnp.float32) * 0.1
    w3 = jax.random.normal(ks[4], (1, ndf), jnp.float32) * (1.0 / ndf ** 0.5)
    b3 = jax.random.normal(ks[5], (1,), jnp.float32) * 0.1
    return dict(w1=w1, b1=b1, w2=w2, b2=b2, w3=w3, b3=b3)


def reference_forward(x, params):
    w1 = params["w1"].reshape(params["w1"].shape[0], -1)  # (ndf, nc)
    y = jnp.einsum("ncdhw,oc->nodhw", x, w1) + params["b1"][None, :, None, None, None]
    y = jnp.where(y >= 0, y, 0.2 * y)
    z = jnp.einsum("ncdhw,ocdhw->no", y, params["w2"]) + params["b2"][None, :]
    z = jnp.where(z >= 0, z, 0.2 * z)
    logit = z @ params["w3"].T + params["b3"][None, :]
    return jax.nn.sigmoid(logit)


if __name__ == "__main__":
    N, nc, ndf, R = 2, 4, 32, 4   # base resolution 4x4x4 (required by the 4^3 valid conv)
    key = jax.random.PRNGKey(0)
    kx, kp = jax.random.split(key)
    x = jax.random.normal(kx, (N, nc, R, R, R), jnp.float32)
    params = init_params(kp, nc, ndf)
    ref = reference_forward(x, params)

    # Production config: bf16 MXU operands (loosened tolerance covers the
    # bf16 operand quantization of the 2048-deep contraction; accumulation is f32).
    packed_bf16 = pack_params(params)                      # computed once, reused every call
    out = jax.block_until_ready(discriminator_forward(x, packed_bf16))
    assert out.shape == (N, 1), out.shape
    if not jnp.allclose(out, ref, rtol=2e-2, atol=2e-2):
        raise AssertionError(f"Pallas (bf16 MXU) output mismatch: {out} vs {ref}")

    # Layout sanity check at full f32 precision (tight tolerance catches any
    # packing/ordering bug that the loose bf16 tolerance could hide).
    packed_f32 = pack_params(params, mxu_dtype=jnp.float32)
    out_f32 = jax.block_until_ready(discriminator_forward(x, packed_f32))
    if not jnp.allclose(out_f32, ref, rtol=1e-4, atol=1e-4):
        raise AssertionError(f"Pallas (f32) output mismatch: {out_f32} vs {ref}")

    print("KERNEL_OK")
</pallas_src>

<mosaic_0001>
module attributes {stable_mosaic.version = 11 : i64} {
  func.func @discriminator_fused_kernel(%arg0: i32, %arg1: memref<2x256xf32, #tpu.memory_space<vmem>>, %arg2: memref<4x2048xf32, #tpu.memory_space<vmem>>, %arg3: memref<1x2048xf32, #tpu.memory_space<vmem>>, %arg4: memref<2048x32xbf16, #tpu.memory_space<vmem>>, %arg5: memref<1x32xf32, #tpu.memory_space<vmem>>, %arg6: memref<32x1xbf16, #tpu.memory_space<vmem>>, %arg7: memref<1x1xf32, #tpu.memory_space<vmem>>, %arg8: memref<2x1xf32, #tpu.memory_space<vmem>>) attributes {dimension_semantics = [#tpu.dimension_semantics<parallel>], iteration_bounds = array<i64: 1>, scalar_prefetch = 0 : i64, scratch_operands = 0 : i64, tpu.core_type = #tpu.core_type<tc>, window_params = [{transform_indices = @transform_0, window_bounds = array<i64: 2, 256>}, {pipeline_mode = #tpu.pipeline_mode<synchronous>, transform_indices = @transform_1, window_bounds = array<i64: 4, 2048>}, {pipeline_mode = #tpu.pipeline_mode<synchronous>, transform_indices = @transform_2, window_bounds = array<i64: 1, 2048>}, {pipeline_mode = #tpu.pipeline_mode<synchronous>, transform_indices = @transform_3, window_bounds = array<i64: 2048, 32>}, {pipeline_mode = #tpu.pipeline_mode<synchronous>, transform_indices = @transform_4, window_bounds = array<i64: 1, 32>}, {pipeline_mode = #tpu.pipeline_mode<synchronous>, transform_indices = @transform_5, window_bounds = array<i64: 32, 1>}, {pipeline_mode = #tpu.pipeline_mode<synchronous>, transform_indices = @transform_6, window_bounds = array<i64: 1, 1>}, {transform_indices = @transform_7, window_bounds = array<i64: 2, 1>}]} {
    %c0 = arith.constant 0 : index
    %c0_0 = arith.constant 0 : index
    %0 = vector.load %arg1[%c0, %c0_0] : memref<2x256xf32, #tpu.memory_space<vmem>>, vector<2x256xf32>
    %c0_1 = arith.constant 0 : index
    %c0_2 = arith.constant 0 : index
    %1 = vector.load %arg2[%c0_1, %c0_2] : memref<4x2048xf32, #tpu.memory_space<vmem>>, vector<4x2048xf32>
    %2 = vector.extract_strided_slice %0 {offsets = [0, 0], sizes = [2, 64], strides = [1, 1]} : vector<2x256xf32> to vector<2x64xf32>
    %3 = tpu.concatenate %2, %2 in 1 : vector<2x64xf32>, vector<2x64xf32> -> vector<2x128xf32>
    %4 = tpu.concatenate %3, %3 in 1 : vector<2x128xf32>, vector<2x128xf32> -> vector<2x256xf32>
    %5 = tpu.concatenate %4, %4 in 1 : vector<2x256xf32>, vector<2x256xf32> -> vector<2x512xf32>
    %6 = tpu.concatenate %5, %5 in 1 : vector<2x512xf32>, vector<2x512xf32> -> vector<2x1024xf32>
    %7 = tpu.concatenate %6, %6 in 1 : vector<2x1024xf32>, vector<2x1024xf32> -> vector<2x2048xf32>
    %8 = vector.extract_strided_slice %1 {offsets = [0, 0], sizes = [1, 2048], strides = [1, 1]} : vector<4x2048xf32> to vector<1x2048xf32>
    %9 = vector.broadcast %8 : vector<1x2048xf32> to vector<2x2048xf32>
    %10 = arith.mulf %7, %9 : vector<2x2048xf32>
    %11 = vector.extract_strided_slice %0 {offsets = [0, 64], sizes = [2, 64], strides = [1, 1]} : vector<2x256xf32> to vector<2x64xf32>
    %12 = tpu.concatenate %11, %11 in 1 : vector<2x64xf32>, vector<2x64xf32> -> vector<2x128xf32>
    %13 = tpu.concatenate %12, %12 in 1 : vector<2x128xf32>, vector<2x128xf32> -> vector<2x256xf32>
    %14 = tpu.concatenate %13, %13 in 1 : vector<2x256xf32>, vector<2x256xf32> -> vector<2x512xf32>
    %15 = tpu.concatenate %14, %14 in 1 : vector<2x512xf32>, vector<2x512xf32> -> vector<2x1024xf32>
    %16 = tpu.concatenate %15, %15 in 1 : vector<2x1024xf32>, vector<2x1024xf32> -> vector<2x2048xf32>
    %17 = vector.extract_strided_slice %1 {offsets = [1, 0], sizes = [1, 2048], strides = [1, 1]} : vector<4x2048xf32> to vector<1x2048xf32>
    %18 = vector.broadcast %17 : vector<1x2048xf32> to vector<2x2048xf32>
    %19 = arith.mulf %16, %18 : vector<2x2048xf32>
    %20 = arith.addf %10, %19 : vector<2x2048xf32>
    %21 = vector.extract_strided_slice %0 {offsets = [0, 128], sizes = [2, 64], strides = [1, 1]} : vector<2x256xf32> to vector<2x64xf32>
    %22 = tpu.concatenate %21, %21 in 1 : vector<2x64xf32>, vector<2x64xf32> -> vector<2x128xf32>
    %23 = tpu.concatenate %22, %22 in 1 : vector<2x128xf32>, vector<2x128xf32> -> vector<2x256xf32>
    %24 = tpu.concatenate %23, %23 in 1 : vector<2x256xf32>, vector<2x256xf32> -> vector<2x512xf32>
    %25 = tpu.concatenate %24, %24 in 1 : vector<2x512xf32>, vector<2x512xf32> -> vector<2x1024xf32>
    %26 = tpu.concatenate %25, %25 in 1 : vector<2x1024xf32>, vector<2x1024xf32> -> vector<2x2048xf32>
    %27 = vector.extract_strided_slice %1 {offsets = [2, 0], sizes = [1, 2048], strides = [1, 1]} : vector<4x2048xf32> to vector<1x2048xf32>
    %28 = vector.broadcast %27 : vector<1x2048xf32> to vector<2x2048xf32>
    %29 = arith.mulf %26, %28 : vector<2x2048xf32>
    %30 = arith.addf %20, %29 : vector<2x2048xf32>
    %31 = vector.extract_strided_slice %0 {offsets = [0, 192], sizes = [2, 64], strides = [1, 1]} : vector<2x256xf32> to vector<2x64xf32>
    %32 = tpu.concatenate %31, %31 in 1 : vector<2x64xf32>, vector<2x64xf32> -> vector<2x128xf32>
    %33 = tpu.concatenate %32, %32 in 1 : vector<2x128xf32>, vector<2x128xf32> -> vector<2x256xf32>
    %34 = tpu.concatenate %33, %33 in 1 : vector<2x256xf32>, vector<2x256xf32> -> vector<2x512xf32>
    %35 = tpu.concatenate %34, %34 in 1 : vector<2x512xf32>, vector<2x512xf32> -> vector<2x1024xf32>
    %36 = tpu.concatenate %35, %35 in 1 : vector<2x1024xf32>, vector<2x1024xf32> -> vector<2x2048xf32>
    %37 = vector.extract_strided_slice %1 {offsets = [3, 0], sizes = [1, 2048], strides = [1, 1]} : vector<4x2048xf32> to vector<1x2048xf32>
    %38 = vector.broadcast %37 : vector<1x2048xf32> to vector<2x2048xf32>
    %39 = arith.mulf %36, %38 : vector<2x2048xf32>
    %40 = arith.addf %30, %39 : vector<2x2048xf32>
    %c0_3 = arith.constant 0 : index
    %c0_4 = arith.constant 0 : index
    %41 = vector.load %arg3[%c0_3, %c0_4] : memref<1x2048xf32, #tpu.memory_space<vmem>>, vector<1x2048xf32>
    %42 = vector.broadcast %41 : vector<1x2048xf32> to vector<2x2048xf32>
    %43 = arith.addf %40, %42 : vector<2x2048xf32>
    %cst = arith.constant 0.000000e+00 : f32
    %44 = vector.broadcast %cst : f32 to vector<2x2048xf32>
    %45 = arith.cmpf oge, %43, %44 : vector<2x2048xf32>
    %cst_5 = arith.constant 2.000000e-01 : f32
    %46 = vector.broadcast %cst_5 : f32 to vector<2x2048xf32>
    %47 = arith.mulf %46, %43 : vector<2x2048xf32>
    %48 = arith.select %45, %43, %47 : vector<2x2048xi1>, vector<2x2048xf32>
    %49 = arith.truncf %48 : vector<2x2048xf32> to vector<2x2048xbf16>
    %c0_6 = arith.constant 0 : index
    %c0_7 = arith.constant 0 : index
    %50 = vector.load %arg4[%c0_6, %c0_7] : memref<2048x32xbf16, #tpu.memory_space<vmem>>, vector<2048x32xbf16>
    %cst_8 = arith.constant dense<0.000000e+00> : vector<2x32xf32>
    %51 = tpu.matmul %49, %50, %cst_8 {dimension_numbers = #tpu.dot_dimension_numbers<[1], [0], [0], [1], [0, 0, 1, 1], [], []>} : vector<2x2048xbf16>, vector<2048x32xbf16>, vector<2x32xf32> -> vector<2x32xf32>
    %c0_9 = arith.constant 0 : index
    %c0_10 = arith.constant 0 : index
    %52 = vector.load %arg5[%c0_9, %c0_10] : memref<1x32xf32, #tpu.memory_space<vmem>>, vector<1x32xf32>
    %53 = vector.broadcast %52 : vector<1x32xf32> to vector<2x32xf32>
    %54 = arith.addf %51, %53 : vector<2x32xf32>
    %cst_11 = arith.constant 0.000000e+00 : f32
    %55 = vector.broadcast %cst_11 : f32 to vector<2x32xf32>
    %56 = arith.cmpf oge, %54, %55 : vector<2x32xf32>
    %cst_12 = arith.constant 2.000000e-01 : f32
    %57 = vector.broadcast %cst_12 : f32 to vector<2x32xf32>
    %58 = arith.mulf %57, %54 : vector<2x32xf32>
    %59 = arith.select %56, %54, %58 : vector<2x32xi1>, vector<2x32xf32>
    %60 = arith.truncf %59 : vector<2x32xf32> to vector<2x32xbf16>
    %c0_13 = arith.constant 0 : index
    %c0_14 = arith.constant 0 : index
    %61 = vector.load %arg6[%c0_13, %c0_14] : memref<32x1xbf16, #tpu.memory_space<vmem>>, vector<32x1xbf16>
    %cst_15 = arith.constant dense<0.000000e+00> : vector<2x1xf32>
    %62 = tpu.matmul %60, %61, %cst_15 {dimension_numbers = #tpu.dot_dimension_numbers<[1], [0], [0], [1], [0, 0, 1, 1], [], []>} : vector<2x32xbf16>, vector<32x1xbf16>, vector<2x1xf32> -> vector<2x1xf32>
    %c0_16 = arith.constant 0 : index
    %c0_17 = arith.constant 0 : index
    %63 = vector.load %arg7[%c0_16, %c0_17] : memref<1x1xf32, #tpu.memory_space<vmem>>, vector<1x1xf32>
    %64 = vector.broadcast %63 : vector<1x1xf32> to vector<2x1xf32>
    %65 = arith.addf %62, %64 : vector<2x1xf32>
    %66 = math.absf %65 : vector<2x1xf32>
    %cst_18 = arith.constant 0.000000e+00 : f32
    %67 = vector.broadcast %cst_18 : f32 to vector<2x1xf32>
    %68 = arith.subf %67, %66 : vector<2x1xf32>
    %69 = math.exp %68 : vector<2x1xf32>
    %cst_19 = arith.constant 0.000000e+00 : f32
    %70 = vector.broadcast %cst_19 : f32 to vector<2x1xf32>
    %71 = arith.cmpf oge, %65, %70 : vector<2x1xf32>
    %cst_20 = arith.constant 1.000000e+00 : f32
    %72 = vector.broadcast %cst_20 : f32 to vector<2x1xf32>
    %73 = arith.addf %72, %69 : vector<2x1xf32>
    %cst_21 = arith.constant 1.000000e+00 : f32
    %74 = vector.broadcast %cst_21 : f32 to vector<2x1xf32>
    %75 = arith.divf %74, %73 : vector<2x1xf32>
    %cst_22 = arith.constant 1.000000e+00 : f32
    %76 = vector.broadcast %cst_22 : f32 to vector<2x1xf32>
    %77 = arith.addf %76, %69 : vector<2x1xf32>
    %78 = arith.divf %69, %77 : vector<2x1xf32>
    %79 = arith.select %71, %75, %78 : vector<2x1xi1>, vector<2x1xf32>
    %c0_23 = arith.constant 0 : index
    %c0_24 = arith.constant 0 : index
    %80 = vector.load %arg8[%c0_23, %c0_24] : memref<2x1xf32, #tpu.memory_space<vmem>>, vector<2x1xf32>
    tpu.vector_store %arg8[%c0_23, %c0_24], %79 {strides = array<i32>} : memref<2x1xf32, #tpu.memory_space<vmem>>, vector<2x1xf32>,
    return
  }
  func.func @transform_0(%arg0: i32) -> (i32, i32) {
    %c0_i32 = arith.constant 0 : i32
    %c0_i32_0 = arith.constant 0 : i32
    return %arg0, %c0_i32 : i32, i32
  }
  func.func @transform_1(%arg0: i32) -> (i32, i32) {
    %c0_i32 = arith.constant 0 : i32
    %c0_i32_0 = arith.constant 0 : i32
    %c0_i32_1 = arith.constant 0 : i32
    return %c0_i32, %c0_i32_0 : i32, i32
  }
  func.func @transform_2(%arg0: i32) -> (i32, i32) {
    %c0_i32 = arith.constant 0 : i32
    %c0_i32_0 = arith.constant 0 : i32
    %c0_i32_1 = arith.constant 0 : i32
    return %c0_i32, %c0_i32_0 : i32, i32
  }
  func.func @transform_3(%arg0: i32) -> (i32, i32) {
    %c0_i32 = arith.constant 0 : i32
    %c0_i32_0 = arith.constant 0 : i32
    %c0_i32_1 = arith.constant 0 : i32
    return %c0_i32, %c0_i32_0 : i32, i32
  }
  func.func @transform_4(%arg0: i32) -> (i32, i32) {
    %c0_i32 = arith.constant 0 : i32
    %c0_i32_0 = arith.constant 0 : i32
    %c0_i32_1 = arith.constant 0 : i32
    return %c0_i32, %c0_i32_0 : i32, i32
  }
  func.func @transform_5(%arg0: i32) -> (i32, i32) {
    %c0_i32 = arith.constant 0 : i32
    %c0_i32_0 = arith.constant 0 : i32
    %c0_i32_1 = arith.constant 0 : i32
    return %c0_i32, %c0_i32_0 : i32, i32
  }
  func.func @transform_6(%arg0: i32) -> (i32, i32) {
    %c0_i32 = arith.constant 0 : i32
    %c0_i32_0 = arith.constant 0 : i32
    %c0_i32_1 = arith.constant 0 : i32
    return %c0_i32, %c0_i32_0 : i32, i32
  }
  func.func @transform_7(%arg0: i32) -> (i32, i32) {
    %c0_i32 = arith.constant 0 : i32
    %c0_i32_0 = arith.constant 0 : i32
    return %arg0, %c0_i32 : i32, i32
  }
}

</mosaic_0001>

<bundles_post_ra>
// kernel: discriminator_forward.1
= control target key start
LH: loop header
LB: loop body
LE: loop exit
PB: predicated region body
PF: predicated region fallthrough
CT: control target
= control target key end

     0   :  { %v42_v0 = vlaneseq  ;;  %v2815_v1 = vmov 1983009808   ;;  %s2816_s16 = smov 64   ;;  %vm49_vm0 = vcmask 523264   ;;  %s3839_s3 = inlined_call_operand.vmem [shape: bf16[2048,32], index: 3, kind: input, shape index: {}]   ;;  %s3840_s0 = inlined_call_operand.vmem [shape: f32[2,256], index: 0, kind: input, shape index: {}]   ;;  %s3841_s1 = inlined_call_operand.vmem [shape: f32[4,2048], index: 1, kind: input, shape index: {}]   ;;  %s3842_s2 = inlined_call_operand.vmem [shape: f32[1,2048], index: 2, kind: input, shape index: {}]   ;;  %s3843_s5 = inlined_call_operand.vmem [shape: bf16[32,1], index: 5, kind: input, shape index: {}]   ;;  %s3844_s6 = inlined_call_operand.<no memory space> [shape: f32[1,1], index: 6, kind: input, shape index: {}]   ;;  %s3845_s4 = inlined_call_operand.vmem [shape: f32[1,32], index: 4, kind: input, shape index: {}]   ;;  %s3846_s7 = inlined_call_operand.vmem [shape: f32[2,1], index: 7, kind: output, shape index: {}]  }
   0x1   :  { %v40_v2 = vunpack.c.l.s4 %v2815_v1  ;;  %v2681_v4 = vld [vmem:[%s3839_s3 + $0x40] sm:$0xff]   ;;  %v2685_v11 = vld [vmem:[%s3839_s3 + $0x48] sm:$0xff]   ;;  %v2689_v17 = vld [vmem:[%s3839_s3 + $0x50] sm:$0xff]  }
   0x2   :  { %v2859_v3 = vshrl.u32 %v42_v0, 7  ;;  %v2682_v6 = vld [vmem:[%s3839_s3 + $0xc0] sm:$0xff]   ;;  %2490 = vmatprep.subr.bf16.mxu0 %v2681_v4  ;;  %v2686_v13 = vld [vmem:[%s3839_s3 + $0xc8] sm:$0xff]   ;;  %v2690_v18 = vld [vmem:[%s3839_s3 + $0xd0] sm:$0xff]  }
   0x3   :  { %v41_v5 = vunpack.c.0.s8 %v40_v2  ;;  %v2870_v7 = vld [vmem:[%s3840_s0] sm:$0xf]  ;;  %2512 = vmatprep.subr.bf16.mxu1 %v2682_v6  ;;  %v2687_v14 = vld [vmem:[%s3839_s3 + $0x8] sm:$0xff]   ;;  %v2691_v19 = vld [vmem:[%s3839_s3 + $0x10] sm:$0xff]  }
   0x4   :  { %v2683_v8 = vld [vmem:[%s3839_s3] sm:$0xff]   ;;  %v2688_v16 = vld [vmem:[%s3839_s3 + $0x88] sm:$0xff]   ;;  %v2692_v20 = vld [vmem:[%s3839_s3 + $0x90] sm:$0xff]   ;;  %v2974_v43 = vsub.s32 4, %v2859_v3  ;;  %v2977_v44 = vsub.s32 5, %v2859_v3  ;;  %v2980_v45 = vsub.s32 6, %v2859_v3 }
   0x5   :  { %v2684_v9 = vld [vmem:[%s3839_s3 + $0x80] sm:$0xff]   ;;  %v44_v10 = vsub.s32 %v41_v5, %v2859_v3  ;;  %2491 = vmatpush3.bf16.msra.mxu0 %v2683_v8  ;;  %v2693_v21 = vld [vmem:[%s3839_s3 + $0x58] sm:$0xff]   ;;  %v2701_v29 = vld [vmem:[%s3839_s3 + $0x68] sm:$0xff]   ;;  %v2986_v47 = vsub.s32 7, %v2859_v3  ;;  %v2992_v49 = vsub.s32 0, %v2859_v3  ;;  %v2995_v50 = vsub.s32 1, %v2859_v3 }
   0x6   :  { %2513 = vmatpush3.bf16.msra.mxu1 %v2684_v9  ;;  %2492 = vmatprep.subr.bf16.mxu0 %v2685_v11  ;;  %v2694_v22 = vld [vmem:[%s3839_s3 + $0xd8] sm:$0xff]   ;;  %v2697_v25 = vld [vmem:[%s3839_s3 + $0x60] sm:$0xff]   ;;  %v2702_v30 = vld [vmem:[%s3839_s3 + $0xe8] sm:$0xff]   ;;  %v3000_v53 = vsub.s32 2, %v2859_v3  ;;  %v3010_v57 = vsub.s32 3, %v2859_v3 }
   0x7   :  { %v45_v12 = vrot.slane %v2870_v7, %v44_v10  ;;  %2514 = vmatprep.subr.bf16.mxu1 %v2686_v13  ;;  %v2695_v23 = vld [vmem:[%s3839_s3 + $0x18] sm:$0xff]   ;;  %v2698_v26 = vld [vmem:[%s3839_s3 + $0xe0] sm:$0xff]   ;;  %v2703_v31 = vld [vmem:[%s3839_s3 + $0x28] sm:$0xff]  }
   0x8   :  { %v2696_v24 = vld [vmem:[%s3839_s3 + $0x98] sm:$0xff]   ;;  %v2699_v27 = vld [vmem:[%s3839_s3 + $0x20] sm:$0xff]   ;;  %v2704_v32 = vld [vmem:[%s3839_s3 + $0xa8] sm:$0xff]  }
   0x9   :  { %46 = vrot.lane.b32.xlu0 %v45_v12, %s2816_s16  ;;  %v2889_v15 = vcombine.high %v45_v12, %v45_v12  ;;  %2493 = vmatpush3.bf16.msra.mxu0 %v2687_v14  ;;  %v2700_v28 = vld [vmem:[%s3839_s3 + $0xa0] sm:$0xff]   ;;  %v2705_v33 = vld [vmem:[%s3839_s3 + $0x70] sm:$0xff]   ;;  %v2709_v37 = vld [vmem:[%s3839_s3 + $0x78] sm:$0xff]  }
   0xa   :  { %2515 = vmatpush3.bf16.msra.mxu1 %v2688_v16  ;;  %2494 = vmatprep.subr.bf16.mxu0 %v2689_v17  ;;  %v2706_v34 = vld [vmem:[%s3839_s3 + $0xf0] sm:$0xff]   ;;  %v2710_v38 = vld [vmem:[%s3839_s3 + $0xf8] sm:$0xff]   ;;  %v2713_v41 = vld [vmem:[%s3839_s3 + $0x140] sm:$0xff]  }
   0xb   :  { %2516 = vmatprep.subr.bf16.mxu1 %v2690_v18  ;;  %v2707_v35 = vld [vmem:[%s3839_s3 + $0x30] sm:$0xff]   ;;  %v2711_v39 = vld [vmem:[%s3839_s3 + $0x38] sm:$0xff]   ;;  %v2714_v42 = vld [vmem:[%s3839_s3 + $0x1c0] sm:$0xff]  }
   0xc   :  { %v2708_v36 = vld [vmem:[%s3839_s3 + $0xb0] sm:$0xff]   ;;  %v2712_v40 = vld [vmem:[%s3839_s3 + $0xb8] sm:$0xff]   ;;  %v30_v46 = vld [vmem:[%s3841_s1] sm:$0xff] }
   0xd   :  { %398 = vrot.lane.b32.xlu0 %v2889_v15, %s2816_s16  ;;  %2495 = vmatpush3.bf16.msra.mxu0 %v2691_v19  ;;  %v31_v48 = vld [vmem:[%s3841_s1 + $0x8] sm:$0xff]  ;;  %v66_v51 = vrot.slane %v30_v46, %v2974_v43  ;;  %v227_v52 = vrot.slane %v30_v46, %v2977_v44  ;;  %v409_v54 = vrot.slane %v30_v46, %v2980_v45  ;;  %v3007_v56 = vld [vmem:[%s3842_s2] sm:$0xff]  ;;  %v32_v11 = vld [vmem:[%s3841_s1 + $0x10] sm:$0xff] }
   0xe   :  { %2517 = vmatpush3.bf16.msra.mxu1 %v2692_v20  ;;  %2496 = vmatprep.subr.bf16.mxu0 %v2693_v21  ;;  %v586_v55 = vrot.slane %v30_v46, %v2986_v47  ;;  %v74_v58 = vrot.slane %v31_v48, %v2974_v43  ;;  %v235_v59 = vrot.slane %v31_v48, %v2977_v44  ;;  %v33_v21 = vld [vmem:[%s3841_s1 + $0x18] sm:$0xff] }
   0xf   :  { %2518 = vmatprep.subr.bf16.mxu1 %v2694_v22  ;;  %v417_v60 = vrot.slane %v31_v48, %v2980_v45  ;;  %v594_v61 = vrot.slane %v31_v48, %v2986_v47  ;;  %v3017_v62 = vrot.slane %v66_v51, %v2992_v49  ;;  %v3020_v63 = vrot.slane %v227_v52, %v2995_v50 }
  0x10   :  { %v62_v1 = vrot.slane %v30_v46, %v2992_v49  ;;  %v3026_v2 = vrot.slane %v409_v54, %v3000_v53  ;;  %v3029_v3 = vrot.slane %v586_v55, %v3010_v57  ;;  %v223_v4 = vrot.slane %v30_v46, %v2995_v50 }
  0x11   :  { %2497 = vmatpush3.bf16.msra.mxu0 %v2695_v23  ;;  %v405_v5 = vrot.slane %v30_v46, %v3000_v53  ;;  %v3034_v6 = vrot.slane %v74_v58, %v2992_v49  ;;  %v3037_v8 = vrot.slane %v235_v59, %v2995_v50  ;;  %v582_v9 = vrot.slane %v30_v46, %v3010_v57  ;;  %v34_v59 = vld [vmem:[%s3841_s1 + $0x20] sm:$0xff] }
  0x12   :  { %2519 = vmatpush3.bf16.msra.mxu1 %v2696_v24  ;;  %2498 = vmatprep.subr.bf16.mxu0 %v2697_v25  ;;  %v70_v10 = vrot.slane %v31_v48, %v2992_v49  ;;  %v3045_v12 = vrot.slane %v417_v60, %v3000_v53  ;;  %v3048_v13 = vrot.slane %v594_v61, %v3010_v57 }
  0x13   :  { %2520 = vmatprep.subr.bf16.mxu1 %v2698_v26  ;;  %v231_v16 = vrot.slane %v31_v48, %v2995_v50  ;;  %v3054_v17 = vrot.slane %v62_v1, %v2992_v49  ;;  %v413_v19 = vrot.slane %v31_v48, %v3000_v53  ;;  %v590_v20 = vrot.slane %v31_v48, %v3010_v57 }
  0x14   :  { %v3064_v22 = vrot.slane %v223_v4, %v2995_v50  ;;  %v3067_v23 = vrot.slane %v405_v5, %v3000_v53  ;;  %v82_v24 = vrot.slane %v32_v11, %v2974_v43  ;;  %v243_v25 = vrot.slane %v32_v11, %v2977_v44  ;;  %v3134_v5 = vld [vmem:[%s3842_s2 + $0x8] sm:$0xff] }
  0x15   :  { %2499 = vmatpush3.bf16.msra.mxu0 %v2699_v27  ;;  %v3072_v26 = vrot.slane %v582_v9, %v3010_v57  ;;  %v3075_v27 = vrot.slane %v70_v10, %v2992_v49  ;;  %v239_v48 = vrot.slane %v32_v11, %v2995_v50  ;;  %v421_v51 = vrot.slane %v32_v11, %v3000_v53 }
  0x16   :  { %2521 = vmatpush3.bf16.msra.mxu1 %v2700_v28  ;;  %2500 = vmatprep.subr.bf16.mxu0 %v2701_v29  ;;  %v425_v28 = vrot.slane %v32_v11, %v2980_v45  ;;  %v602_v29 = vrot.slane %v32_v11, %v2986_v47  ;;  %v598_v58 = vrot.slane %v32_v11, %v3010_v57 }
  0x17   :  { %2522 = vmatprep.subr.bf16.mxu1 %v2702_v30  ;;  %v3080_v30 = vrot.slane %v231_v16, %v2995_v50  ;;  %v86_v1 = vrot.slane %v33_v21, %v2992_v49  ;;  %v247_v4 = vrot.slane %v33_v21, %v2995_v50  ;;  %3849 = vst [vmem:[#allocation3_spill] sm:$0xff] %v3134_v5 }
  0x18   :  { %v3107_v46 = vrot.slane %v602_v29, %v3010_v57  ;;  %v606_v16 = vrot.slane %v33_v21, %v3010_v57  ;;  %v437_v10 = vrot.slane %v34_v59, %v3000_v53 }
  0x19   :  { %2501 = vmatpush3.bf16.msra.mxu0 %v2703_v31 }
  0x1a   :  { %2523 = vmatpush3.bf16.msra.mxu1 %v2704_v32  ;;  %2502 = vmatprep.subr.bf16.mxu0 %v2705_v33  ;;  %v90_v32 = vrot.slane %v33_v21, %v2974_v43  ;;  %v251_v33 = vrot.slane %v33_v21, %v2977_v44  ;;  %v3213_v5 = vrot.slane %v437_v10, %v3000_v53 }
  0x1b   :  { %2524 = vmatprep.subr.bf16.mxu1 %v2706_v34  ;;  %v3087_v34 = vrot.slane %v413_v19, %v3000_v53  ;;  %v3144_v19 = vrot.slane %v239_v48, %v2995_v50  ;;  %v614_v48 = vrot.slane %v34_v59, %v3010_v57 }
  0x1c   :  { %v3112_v52 = vrot.slane %v90_v32, %v2992_v49  ;;  %v3115_v54 = vrot.slane %v251_v33, %v2995_v50  ;;  %v441_v32 = vrot.slane %v34_v59, %v2980_v45  ;;  %v3159_v33 = vrot.slane %v86_v1, %v2992_v49  ;;  %3855 = vst [vmem:[#allocation9_spill] sm:$0xff] %v3213_v5 }
  0x1d   :  { %2503 = vmatpush3.bf16.msra.mxu0 %v2707_v35  ;;  %v3090_v35 = vrot.slane %v590_v20, %v3010_v57  ;;  %v3147_v20 = vrot.slane %v421_v51, %v3000_v53  ;;  %v94_v1 = vrot.slane %v34_v59, %v2992_v49 }
  0x1e   :  { %2525 = vmatpush3.bf16.msra.mxu1 %v2708_v36  ;;  %2504 = vmatprep.subr.bf16.mxu0 %v2709_v37  ;;  %v433_v36 = vrot.slane %v33_v21, %v2980_v45  ;;  %v610_v37 = vrot.slane %v33_v21, %v2986_v47 }
  0x1f   :  { %2526 = vmatprep.subr.bf16.mxu1 %v2710_v38  ;;  %v3095_v38 = vrot.slane %v82_v24, %v2992_v49  ;;  %v98_v24 = vrot.slane %v34_v59, %v2974_v43 }
  0x20   :  { %v3124_v60 = vrot.slane %v433_v36, %v3000_v53  ;;  %v3127_v61 = vrot.slane %v610_v37, %v3010_v57  ;;  %v3162_v36 = vrot.slane %v247_v4, %v2995_v50  ;;  %v255_v4 = vrot.slane %v34_v59, %v2995_v50 }
  0x21   :  { %2505 = vmatpush3.bf16.msra.mxu0 %v2711_v39  ;;  %v3098_v39 = vrot.slane %v243_v25, %v2995_v50  ;;  %v259_v25 = vrot.slane %v34_v59, %v2977_v44  ;;  %v3180_v29 = vrot.slane %v98_v24, %v2992_v49  ;;  %v3198_v24 = vld [vmem:[%s3841_s1 + $0x30] sm:$0xff] }
  0x22   :  { %2527 = vmatpush3.bf16.msra.mxu1 %v2712_v40  ;;  %2534 = vmatprep.subr.bf16.mxu0 %v2713_v41  ;;  %v78_v41 = vrot.slane %v32_v11, %v2992_v49  ;;  %v429_v11 = vrot.slane %v33_v21, %v3000_v53  ;;  %v618_v21 = vrot.slane %v34_v59, %v2986_v47 }
  0x23   :  { %2556 = vmatprep.subr.bf16.mxu1 %v2714_v42  ;;  %v3104_v42 = vrot.slane %v425_v28, %v3000_v53  ;;  %v3152_v28 = vrot.slane %v598_v58, %v3010_v57  ;;  %v3175_v58 = vrot.slane %v606_v16, %v3010_v57  ;;  %v3183_v37 = vrot.slane %v259_v25, %v2995_v50 }
  0x24   :  { %v3137_v9 = vrot.slane %v78_v41, %v2992_v49  ;;  %v35_v41 = vld [vmem:[%s3841_s1 + $0x28] sm:$0xff]  ;;  %v3172_v51 = vrot.slane %v429_v11, %v3000_v53  ;;  %v3188_v11 = vrot.slane %v441_v32, %v3000_v53  ;;  %v3191_v16 = vrot.slane %v618_v21, %v3010_v57 }
  0x25   :  { %3850 = vst [vmem:[#allocation4_spill] sm:$0xff] %v3152_v28  ;;  %3851 = vst [vmem:[#allocation5_spill] sm:$0xff] %v3175_v58  ;;  %v106_v55 = vrot.slane %v35_v41, %v2974_v43  ;;  %v267_v40 = vrot.slane %v35_v41, %v2977_v44  ;;  %v449_v25 = vrot.slane %v35_v41, %v2980_v45 }
  0x26   :  { %3852 = vst [vmem:[#allocation6_spill] sm:$0xff] %v3191_v16  ;;  %v626_v31 = vrot.slane %v35_v41, %v2986_v47  ;;  %v102_v59 = vrot.slane %v35_v41, %v2992_v49  ;;  %v263_v32 = vrot.slane %v35_v41, %v2995_v50  ;;  %v3205_v21 = vrot.slane %v94_v1, %v2992_v49 }
  0x27   :  { %v3208_v18 = vrot.slane %v255_v4, %v2995_v50  ;;  %v445_v14 = vrot.slane %v35_v41, %v3000_v53  ;;  %v622_v0 = vrot.slane %v35_v41, %v3010_v57  ;;  %v3216_v16 = vrot.slane %v614_v48, %v3010_v57  ;;  %v3225_v4 = vld [vmem:[%s3841_s1 + $0x38] sm:$0xff] }
  0x28   :  { %3853 = vst [vmem:[#allocation7_spill] sm:$0xff] %v3205_v21  ;;  %v114_v58 = vrot.slane %v3198_v24, %v2974_v43  ;;  %v275_v1 = vrot.slane %v3198_v24, %v2977_v44  ;;  %v3231_v10 = vrot.slane %v267_v40, %v2995_v50  ;;  %v457_v41 = vrot.slane %v3198_v24, %v2980_v45 }
  0x29   :  { %3854 = vst [vmem:[#allocation8_spill] sm:$0xff] %v3208_v18  ;;  %3856 = vst [vmem:[#allocation10_spill] sm:$0xff] %v3216_v16  ;;  %v3228_v18 = vrot.slane %v106_v55, %v2992_v49  ;;  %v634_v48 = vrot.slane %v3198_v24, %v2986_v47  ;;  %v3238_v16 = vrot.slane %v449_v25, %v3000_v53 }
  0x2a   :  { %3857 = vst [vmem:[#allocation11_spill] sm:$0xff] %v3231_v10  ;;  %v3241_v5 = vrot.slane %v626_v31, %v3010_v57  ;;  %v3244_v28 = vrot.slane %v102_v59, %v2992_v49  ;;  %v3247_v55 = vrot.slane %v263_v32, %v2995_v50  ;;  %v3250_v40 = vrot.slane %v445_v14, %v3000_v53 }
  0x2b   :  { %v3253_v21 = vrot.slane %v622_v0, %v3010_v57  ;;  %v122_v10 = vrot.slane %v3225_v4, %v2974_v43  ;;  %v283_v25 = vrot.slane %v3225_v4, %v2977_v44  ;;  %v3263_v59 = vrot.slane %v275_v1, %v2995_v50 }
  0x2c   :  { %3858 = vst [vmem:[#allocation12_spill] sm:$0xff] %v3241_v5  ;;  %v3260_v5 = vrot.slane %v114_v58, %v2992_v49  ;;  %v3278_v58 = vrot.slane %v457_v41, %v3000_v53  ;;  %v3281_v1 = vrot.slane %v634_v48, %v3010_v57 }
  0x2d   :  { %3859 = vst [vmem:[#allocation13_spill] sm:$0xff] %v3253_v21  ;;  %3861 = vst [vmem:[#allocation15_spill] sm:$0xff] %v3263_v59 }
  0x2e   :  { %3860 = vst [vmem:[#allocation14_spill] sm:$0xff] %v3260_v5  ;;  %3862 = vst [vmem:[#allocation16_spill] sm:$0xff] %v3278_v58 }
  0x2f   :  { %3863 = vst [vmem:[#allocation17_spill] sm:$0xff] %v3281_v1 }
  0x7b   :  { %v47_v31 = vpop.permute.xlu0 %46 }
  0x7c   :  { %v3271_v32 = vsel %vm49_vm0, %v2870_v7, %v47_v31  ;;  %v3275_v21 = vsel %vm49_vm0, %v47_v31, %v2870_v7 }
  0x7d   :  { %v204_v14 = vmul.f32 %v3017_v62, %v3271_v32  ;;  %v365_v0 = vmul.f32 %v3020_v63, %v3275_v21  ;;  %v206_v59 = vmul.f32 %v3034_v6, %v3271_v32  ;;  %v367_v5 = vmul.f32 %v3037_v8, %v3275_v21 }
  0x7e   :  { %v203_v7 = vmul.f32 %v3054_v17, %v3271_v32  ;;  %v364_v41 = vmul.f32 %v3064_v22, %v3275_v21  ;;  %v205_v48 = vmul.f32 %v3075_v27, %v3271_v32  ;;  %v366_v62 = vmul.f32 %v3080_v30, %v3275_v21 }
  0x7f   :  { %v399_v31 = vpop.permute.xlu0 %398  ;;  %v381_v63 = vadd.f32 %v365_v0, %v204_v14  ;;  %v383_v1 = vadd.f32 %v367_v5, %v206_v59  ;;  %v208_v6 = vmul.f32 %v3095_v38, %v3271_v32  ;;  %v369_v8 = vmul.f32 %v3098_v39, %v3275_v21 }
  0x80   :  { %v3305_v17 = vsel %vm49_vm0, %v2889_v15, %v399_v31  ;;  %v3309_v22 = vsel %vm49_vm0, %v399_v31, %v2889_v15  ;;  %v380_v27 = vadd.f32 %v364_v41, %v203_v7  ;;  %v382_v58 = vadd.f32 %v366_v62, %v205_v48 }
  0x81   :  { %v547_v30 = vmul.f32 %v3026_v2, %v3305_v17  ;;  %v724_v5 = vmul.f32 %v3029_v3, %v3309_v22  ;;  %v549_v38 = vmul.f32 %v3045_v12, %v3305_v17  ;;  %v726_v39 = vmul.f32 %v3048_v13, %v3309_v22 }
  0x82   :  { %v546_v59 = vmul.f32 %v3067_v23, %v3305_v17  ;;  %v723_v15 = vmul.f32 %v3072_v26, %v3309_v22  ;;  %v548_v14 = vmul.f32 %v3087_v34, %v3305_v17  ;;  %v725_v2 = vmul.f32 %v3090_v35, %v3309_v22 }
  0x83   :  { %v563_v0 = vadd.f32 %v547_v30, %v381_v63  ;;  %v565_v3 = vadd.f32 %v549_v38, %v383_v1  ;;  %v385_v7 = vadd.f32 %v369_v8, %v208_v6  ;;  %v551_v12 = vmul.f32 %v3104_v42, %v3305_v17 }
  0x84   :  { %v562_v41 = vadd.f32 %v546_v59, %v380_v27  ;;  %v564_v13 = vadd.f32 %v548_v14, %v382_v58  ;;  %v728_v23 = vmul.f32 %v3107_v46, %v3309_v22  ;;  %v210_v26 = vmul.f32 %v3112_v52, %v3271_v32 }
  0x85   :  { %v740_v48 = vadd.f32 %v724_v5, %v563_v0  ;;  %v742_v62 = vadd.f32 %v726_v39, %v565_v3  ;;  %v567_v34 = vadd.f32 %v551_v12, %v385_v7  ;;  %v371_v35 = vmul.f32 %v3115_v54, %v3275_v21 }
  0x86   :  { %v739_v31 = vadd.f32 %v723_v15, %v562_v41  ;;  %v741_v1 = vadd.f32 %v725_v2, %v564_v13  ;;  %v3336_v63 = vrot.slane %v122_v10, %v2992_v49  ;;  %v3339_v42 = vrot.slane %v283_v25, %v2995_v50 }
  0x87   :  { %v3864_v46 = vrot.slane %v3007_v56, %v2995_v50  ;;  %v3865_v52 = vrot.slane %v3007_v56, %v3010_v57  ;;  %v744_v8 = vadd.f32 %v728_v23, %v567_v34  ;;  %v553_v54 = vmul.f32 %v3124_v60, %v3305_v17 }
  0x88   :  { %v3866_v27 = vrot.slane %v3007_v56, %v2992_v49  ;;  %v3867_v25 = vrot.slane %v3007_v56, %v3000_v53  ;;  %v387_v5 = vadd.f32 %v371_v35, %v210_v26  ;;  %v730_v38 = vmul.f32 %v3127_v61, %v3309_v22  ;;  %v2715_v61 = vld [vmem:[%s3839_s3 + $0x100] sm:$0xff]   ;;  %v2717_v35 = vld [vmem:[%s3839_s3 + $0x148] sm:$0xff]  }
  0x89   :  { %v840_v58 = vadd.f32 %v3864_v46, %v740_v48  ;;  %v842_v6 = vadd.f32 %v3865_v52, %v742_v62  ;;  %v3868_v0 = vrot.slane %v3007_v56, %v2977_v44  ;;  %v2716_v26 = vld [vmem:[%s3839_s3 + $0x180] sm:$0xff]   ;;  %v3869_v46 = vrot.slane %v3225_v4, %v2980_v45 }
  0x8a   :  { %v839_v10 = vadd.f32 %v3866_v27, %v739_v31  ;;  %v841_v30 = vadd.f32 %v3867_v25, %v741_v1  ;;  %v569_v7 = vadd.f32 %v553_v54, %v387_v5  ;;  %v2718_v31 = vld [vmem:[%s3839_s3 + $0x1c8] sm:$0xff]   ;;  %v3870_v52 = vrot.slane %v3225_v4, %v2986_v47 }
  0x8b   :  { %vm856_vm1 = vcmp.ge.f32.partialorder %v840_v58, 0.0  ;;  %v872_v39 = vmul.f32 0.2, %v840_v58  ;;  %vm858_vm2 = vcmp.ge.f32.partialorder %v842_v6, 0.0  ;;  %v874_v59 = vmul.f32 0.2, %v842_v6 }
  0x8c   :  { %vm855_vm3 = vcmp.ge.f32.partialorder %v839_v10, 0.0  ;;  %v871_v15 = vmul.f32 0.2, %v839_v10  ;;  %vm857_vm4 = vcmp.ge.f32.partialorder %v841_v30, 0.0  ;;  %v873_v60 = vmul.f32 0.2, %v841_v30 }
  0x8d   :  { %v888_v14 = vsel %vm856_vm1, %v840_v58, %v872_v39  ;;  %v890_v2 = vsel %vm858_vm2, %v842_v6, %v874_v59  ;;  %v844_v3 = vadd.f32 %v3868_v0, %v744_v8  ;;  %v746_v1 = vadd.f32 %v730_v38, %v569_v7  ;;  %v2719_v5 = vld [vmem:[%s3839_s3 + $0x108] sm:$0xff]   ;;  %v2722_v39 = vld [vmem:[%s3839_s3 + $0x1d0] sm:$0xff]  }
  0x8e   :  { %v904_v12 = vpack.c.bf16 %v888_v14, %v888_v14  ;;  %v906_v41 = vpack.c.bf16 %v890_v2, %v890_v2  ;;  %v887_v13 = vsel %vm855_vm3, %v839_v10, %v871_v15  ;;  %v889_v23 = vsel %vm857_vm4, %v841_v30, %v873_v60  ;;  %v2720_v38 = vld [vmem:[%s3839_s3 + $0x188] sm:$0xff]  }
  0x8f   :  { %v903_v48 = vpack.c.bf16 %v887_v13, %v887_v13  ;;  %v905_v62 = vpack.c.bf16 %v889_v23, %v889_v23  ;;  %vm860_vm5 = vcmp.ge.f32.partialorder %v844_v3, 0.0  ;;  %v876_v34 = vmul.f32 0.2, %v844_v3 }
  0x90   :  { %1982 = vmatprep.mubr.bf16.mxu0 %v904_v12  ;;  %2022 = vmatprep.mubr.bf16.mxu1 %v906_v41  ;;  %v3376_v58 = vrot.slane %v3869_v46, %v3000_v53  ;;  %v3382_v6 = vrot.slane %v3870_v52, %v3010_v57  ;;  %v207_v54 = vmul.f32 %v3137_v9, %v3271_v32  ;;  %v2724_v41 = vld [vmem:[%s3839_s3 + $0x190] sm:$0xff]   ;;  %v3873_v52 = vld [vmem:[#allocation7_spill] sm:$0xff]  ;;  %vm2818_vm1 = vmmov 0  }
  0x91   :  { %1983 = vmatmul.mubr.bf16.vlgmr.msra.gmra.mrb[0].mxu0 %v903_v48  ;;  %2023 = vmatmul.mubr.bf16.vlgmr.msra.gmra.mrb[0].mxu1 %v905_v62  ;;  %v892_v8 = vsel %vm860_vm5, %v844_v3, %v876_v34  ;;  %v368_v27 = vmul.f32 %v3144_v19, %v3275_v21  ;;  %v3871_v25 = vrot.slane %v3007_v56, %v2986_v47  ;;  %v2721_v19 = vld [vmem:[%s3839_s3 + $0x150] sm:$0xff]   ;;  %vm2297_vm3 = vcmask 261120  }
  0x92   :  { %2535 = vmatpush3.bf16.msra.mxu0 %v2715_v61  ;;  %2557 = vmatpush3.bf16.msra.mxu1 %v2716_v26  ;;  %v908_v10 = vpack.c.bf16 %v892_v8, %v892_v8  ;;  %v110_v9 = vrot.slane %v3198_v24, %v2992_v49  ;;  %v209_v59 = vmul.f32 %v3159_v33, %v3271_v32  ;;  %v2725_v61 = vld [vmem:[%s3839_s3 + $0x158] sm:$0xff]   ;;  %vm2351_vm4 = vcmask 1024  }
  0x93   :  { %v846_v30 = vadd.f32 %v3871_v25, %v746_v1  ;;  %2536 = vmatprep.subr.bf16.mxu0 %v2717_v35  ;;  %2558 = vmatprep.subr.bf16.mxu1 %v2718_v31  ;;  %v370_v15 = vmul.f32 %v3162_v36, %v3275_v21  ;;  %v271_v60 = vrot.slane %v3198_v24, %v2995_v50  ;;  %v2726_v26 = vld [vmem:[%s3839_s3 + $0x1d8] sm:$0xff]   ;;  %v3875_v25 = vld [vmem:[#allocation8_spill] sm:$0xff] }
  0x94   :  { %2062 = vmatprep.mubr.bf16.mxu0 %v908_v10  ;;  %v550_v2 = vmul.f32 %v3147_v20, %v3305_v17  ;;  %v453_v0 = vrot.slane %v3198_v24, %v3000_v53  ;;  %v384_v3 = vadd.f32 %v368_v27, %v207_v54  ;;  %v552_v7 = vmul.f32 %v3172_v51, %v3305_v17  ;;  %v2723_v20 = vld [vmem:[%s3839_s3 + $0x110] sm:$0xff]   ;;  %v2728_v54 = vld [vmem:[%s3839_s3 + $0x198] sm:$0xff]  }
  0x95   :  { %vm862_vm6 = vcmp.ge.f32.partialorder %v846_v30, 0.0  ;;  %v878_v14 = vmul.f32 0.2, %v846_v30  ;;  %v630_v33 = vrot.slane %v3198_v24, %v3010_v57  ;;  %v118_v36 = vrot.slane %v3225_v4, %v2992_v49  ;;  %v3874_v27 = vld [vmem:[#allocation4_spill] sm:$0xff] }
  0x96   :  { %2537 = vmatpush3.bf16.msra.mxu0 %v2719_v5  ;;  %2559 = vmatpush3.bf16.msra.mxu1 %v2720_v38  ;;  %v212_v51 = vmul.f32 %v3180_v29, %v3271_v32  ;;  %v373_v13 = vmul.f32 %v3183_v37, %v3275_v21  ;;  %v386_v48 = vadd.f32 %v370_v15, %v209_v59  ;;  %v3872_v37 = vld [vmem:[#allocation11_spill] sm:$0xff] }
  0x97   :  { %v894_v12 = vsel %vm862_vm6, %v846_v30, %v878_v14  ;;  %2538 = vmatprep.subr.bf16.mxu0 %v2721_v19  ;;  %2560 = vmatprep.subr.bf16.mxu1 %v2722_v39  ;;  %v214_v62 = vmul.f32 %v3228_v18, %v3271_v32  ;;  %v566_v34 = vadd.f32 %v550_v2, %v384_v3  ;;  %v2729_v5 = vld [vmem:[%s3839_s3 + $0x160] sm:$0xff]   ;;  %v3876_v19 = vld [vmem:[#allocation5_spill] sm:$0xff] }
  0x98   :  { %v910_v23 = vpack.c.bf16 %v894_v12, %v894_v12  ;;  %v555_v29 = vmul.f32 %v3188_v11, %v3305_v17  ;;  %v375_v35 = vmul.f32 %v3872_v37, %v3275_v21  ;;  %v279_v31 = vrot.slane %v3225_v4, %v2995_v50  ;;  %v2727_v11 = vld [vmem:[%s3839_s3 + $0x118] sm:$0xff]   ;;  %v2730_v38 = vld [vmem:[%s3839_s3 + $0x1e0] sm:$0xff]   ;;  %v2734_v37 = vld [vmem:[%s3839_s3 + $0x1e8] sm:$0xff]  }
  0x99   :  { %v568_v1 = vadd.f32 %v552_v7, %v386_v48  ;;  %v557_v46 = vmul.f32 %v3238_v16, %v3305_v17  ;;  %v211_v8 = vmul.f32 %v3873_v52, %v3271_v32  ;;  %v461_v18 = vrot.slane %v3225_v4, %v3000_v53  ;;  %v3877_v7 = vld [vmem:[#allocation9_spill] sm:$0xff]  ;;  %v3880_v52 = vld [vmem:[#allocation12_spill] sm:$0xff] }
  0x9a   :  { %2102 = vmatprep.mubr.bf16.mxu1 %v910_v23  ;;  %2539 = vmatpush3.bf16.msra.mxu0 %v2723_v20  ;;  %v727_v10 = vmul.f32 %v3874_v27, %v3309_v22  ;;  %v389_v16 = vadd.f32 %v373_v13, %v212_v51  ;;  %v372_v30 = vmul.f32 %v3875_v25, %v3275_v21 }
  0x9b   :  { %2561 = vmatpush3.bf16.msra.mxu1 %v2724_v41  ;;  %2540 = vmatprep.subr.bf16.mxu0 %v2725_v61  ;;  %v729_v39 = vmul.f32 %v3876_v19, %v3309_v22  ;;  %v391_v59 = vadd.f32 %v375_v35, %v214_v62  ;;  %v638_v15 = vrot.slane %v3225_v4, %v3010_v57  ;;  %v3878_v41 = vld [vmem:[#allocation6_spill] sm:$0xff] }
  0x9c   :  { %2562 = vmatprep.subr.bf16.mxu1 %v2726_v26  ;;  %v743_v14 = vadd.f32 %v727_v10, %v566_v34  ;;  %v571_v2 = vadd.f32 %v555_v29, %v389_v16  ;;  %v388_v3 = vadd.f32 %v372_v30, %v211_v8  ;;  %v554_v12 = vmul.f32 %v3877_v7, %v3305_v17  ;;  %v2731_v61 = vld [vmem:[%s3839_s3 + $0x120] sm:$0xff]   ;;  %v2735_v30 = vld [vmem:[%s3839_s3 + $0x128] sm:$0xff]  }
  0x9d   :  { %v745_v20 = vadd.f32 %v729_v39, %v568_v1  ;;  %v732_v51 = vmul.f32 %v3878_v41, %v3309_v22  ;;  %v573_v13 = vadd.f32 %v557_v46, %v391_v59  ;;  %v213_v23 = vmul.f32 %v3244_v28, %v3271_v32  ;;  %v2732_v26 = vld [vmem:[%s3839_s3 + $0x1a0] sm:$0xff]   ;;  %v2733_v28 = vld [vmem:[%s3839_s3 + $0x168] sm:$0xff]   ;;  %v3885_v59 = vld [vmem:[#allocation13_spill] sm:$0xff] }
  0x9e   :  { %2541 = vmatpush3.bf16.msra.mxu0 %v2727_v11  ;;  %v570_v48 = vadd.f32 %v554_v12, %v388_v3  ;;  %v3879_v62 = vld [vmem:[#allocation10_spill] sm:$0xff]  ;;  %v374_v29 = vmul.f32 %v3247_v55, %v3275_v21  ;;  %v556_v35 = vmul.f32 %v3250_v40, %v3305_v17  ;;  %v190_v1 = vrot.slane %v110_v9, %v2992_v49  ;;  %v3883_v9 = vld [vmem:[#allocation15_spill] sm:$0xff]  ;;  %v3886_v12 = vld [vmem:[#allocation16_spill] sm:$0xff] }
  0x9f   :  { %2563 = vmatpush3.bf16.msra.mxu1 %v2728_v54  ;;  %v731_v34 = vmul.f32 %v3879_v62, %v3309_v22  ;;  %2542 = vmatprep.subr.bf16.mxu0 %v2729_v5  ;;  %v351_v55 = vrot.slane %v271_v60, %v2995_v50  ;;  %v748_v46 = vadd.f32 %v732_v51, %v571_v2  ;;  %v3882_v10 = vld [vmem:[#allocation14_spill] sm:$0xff]  ;;  %v2736_v5 = vld [vmem:[%s3839_s3 + $0x1a8] sm:$0xff]   ;;  %v2738_v2 = vld [vmem:[%s3839_s3 + $0x1f0] sm:$0xff]  }
  0xa0   :  { %2564 = vmatprep.subr.bf16.mxu1 %v2730_v38  ;;  %v734_v8 = vmul.f32 %v3880_v52, %v3309_v22  ;;  %v390_v54 = vadd.f32 %v374_v29, %v213_v23  ;;  %v3881_v40 = vrot.slane %v3007_v56, %v2974_v43  ;;  %v216_v16 = vmul.f32 %v3882_v10, %v3271_v32  ;;  %v3889_v62 = vld [vmem:[#allocation17_spill] sm:$0xff] }
  0xa1   :  { %v3505_v11 = vadd.f32 %v731_v34, %v570_v48  ;;  %v377_v25 = vmul.f32 %v3883_v9, %v3275_v21  ;;  %v533_v60 = vrot.slane %v453_v0, %v3000_v53  ;;  %v3884_v38 = vrot.slane %v3007_v56, %v2980_v45  ;;  %v2737_v0 = vld [vmem:[%s3839_s3 + $0x170] sm:$0xff]  }
  0xa2   :  { %v843_v27 = vadd.f32 %v3881_v40, %v743_v14  ;;  %2543 = vmatpush3.bf16.msra.mxu0 %v2731_v61  ;;  %v750_v39 = vadd.f32 %v734_v8, %v573_v13  ;;  %v733_v14 = vmul.f32 %v3885_v59, %v3309_v22  ;;  %v572_v3 = vadd.f32 %v556_v35, %v390_v54 }
  0xa3   :  { %2565 = vmatpush3.bf16.msra.mxu1 %v2732_v26  ;;  %v845_v19 = vadd.f32 %v3884_v38, %v745_v20  ;;  %2544 = vmatprep.subr.bf16.mxu0 %v2733_v28  ;;  %v393_v7 = vadd.f32 %v377_v25, %v216_v16  ;;  %v559_v56 = vmul.f32 %v3886_v12, %v3305_v17  ;;  %v3887_v20 = vld [vmem:[#allocation3_spill] sm:$0xff]  ;;  %v2743_v16 = vld [vmem:[%s3839_s3 + $0x138] sm:$0xff]  }
  0xa4   :  { %2566 = vmatprep.subr.bf16.mxu1 %v2734_v37  ;;  %v3888_v41 = vrot.slane %v3887_v20, %v2995_v50  ;;  %v710_v13 = vrot.slane %v630_v33, %v3010_v57  ;;  %v198_v23 = vrot.slane %v118_v36, %v2992_v49  ;;  %v359_v61 = vrot.slane %v279_v31, %v2995_v50  ;;  %v2739_v33 = vld [vmem:[%s3839_s3 + $0x130] sm:$0xff]   ;;  %v2741_v50 = vld [vmem:[%s3839_s3 + $0x178] sm:$0xff]   ;;  %v2746_v38 = vld [vmem:[%s3839_s3 + $0x2c0] sm:$0xff]  }
  0xa5   :  { %v3552_v26 = vadd.f32 %v733_v14, %v572_v3  ;;  %v575_v48 = vadd.f32 %v559_v56, %v393_v7  ;;  %v736_v34 = vmul.f32 %v3889_v62, %v3309_v22  ;;  %v218_v24 = vmul.f32 %v3336_v63, %v3271_v32  ;;  %v2740_v36 = vld [vmem:[%s3839_s3 + $0x1b0] sm:$0xff]   ;;  %v2742_v37 = vld [vmem:[%s3839_s3 + $0x1f8] sm:$0xff]  }
  0xa6   :  { %v848_v51 = vadd.f32 %v3888_v41, %v748_v46  ;;  %2545 = vmatpush3.bf16.msra.mxu0 %v2735_v30  ;;  %v3890_v31 = vrot.slane %v3887_v20, %v3010_v57  ;;  %v379_v63 = vmul.f32 %v3339_v42, %v3275_v21  ;;  %v561_v28 = vmul.f32 %v3376_v58, %v3305_v17 }
  0xa7   :  { %2567 = vmatpush3.bf16.msra.mxu1 %v2736_v5  ;;  %2546 = vmatprep.subr.bf16.mxu0 %v2737_v0  ;;  %vm859_vm7 = vcmp.ge.f32.partialorder %v843_v27, 0.0  ;;  %v875_v35 = vmul.f32 0.2, %v843_v27  ;;  %v877_v46 = vmul.f32 0.2, %v845_v19  ;;  %v3577_v52 = vadd.f32 %v736_v34, %v575_v48  ;;  %v2745_v5 = vld [vmem:[%s3839_s3 + $0x240] sm:$0xff]  }
  0xa8   :  { %v850_v29 = vadd.f32 %v3890_v31, %v750_v39  ;;  %2568 = vmatprep.subr.bf16.mxu1 %v2738_v2  ;;  %vm861_vm8 = vcmp.ge.f32.partialorder %v845_v19, 0.0  ;;  %v395_v8 = vadd.f32 %v379_v63, %v218_v24  ;;  %v215_v54 = vmul.f32 %v190_v1, %v3271_v32  ;;  %v2744_v1 = vld [vmem:[%s3839_s3 + $0x1b8] sm:$0xff]   ;;  %v2752_v48 = vld [vmem:[%s3839_s3 + $0x288] sm:$0xff]   ;;  %v2755_v24 = vld [vmem:[%s3839_s3 + $0x210] sm:$0xff]  }
  0xa9   :  { %v376_v42 = vmul.f32 %v351_v55, %v3275_v21  ;;  %vm864_vm9 = vcmp.ge.f32.partialorder %v848_v51, 0.0  ;;  %v880_v40 = vmul.f32 0.2, %v848_v51  ;;  %v558_v58 = vmul.f32 %v533_v60, %v3305_v17  ;;  %v2759_v31 = vld [vmem:[%s3839_s3 + $0x218] sm:$0xff]   ;;  %v2761_v63 = vld [vmem:[%s3839_s3 + $0x260] sm:$0xff]  }
  0xaa   :  { %v541_v10 = vrot.slane %v461_v18, %v3000_v53  ;;  %2547 = vmatpush3.bf16.msra.mxu0 %v2739_v33  ;;  %v882_v55 = vmul.f32 0.2, %v850_v29  ;;  %v577_v9 = vadd.f32 %v561_v28, %v395_v8  ;;  %v738_v25 = vmul.f32 %v3382_v6, %v3309_v22  ;;  %v2756_v33 = vld [vmem:[%s3839_s3 + $0x290] sm:$0xff]   ;;  %v2762_v28 = vld [vmem:[%s3839_s3 + $0x2e0] sm:$0xff]   ;;  %v2766_v8 = vld [vmem:[%s3839_s3 + $0x2e8] sm:$0xff]  }
  0xab   :  { %2569 = vmatpush3.bf16.msra.mxu1 %v2740_v36  ;;  %v392_v60 = vadd.f32 %v376_v42, %v215_v54  ;;  %2548 = vmatprep.subr.bf16.mxu0 %v2741_v50  ;;  %v891_v18 = vsel %vm859_vm7, %v843_v27, %v875_v35  ;;  %v893_v30 = vsel %vm861_vm8, %v845_v19, %v877_v46  ;;  %vm866_vm10 = vcmp.ge.f32.partialorder %v850_v29, 0.0  ;;  %v2757_v36 = vld [vmem:[%s3839_s3 + $0x258] sm:$0xff]   ;;  %v2764_v35 = vld [vmem:[%s3839_s3 + $0x2a0] sm:$0xff]   ;;  %v2765_v46 = vld [vmem:[%s3839_s3 + $0x268] sm:$0xff]  }
  0xac   :  { %2570 = vmatprep.subr.bf16.mxu1 %v2742_v37  ;;  %v217_v39 = vmul.f32 %v198_v23, %v3271_v32  ;;  %v3603_v59 = vadd.f32 %v738_v25, %v577_v9  ;;  %v735_v14 = vmul.f32 %v710_v13, %v3309_v22  ;;  %v378_v27 = vmul.f32 %v359_v61, %v3275_v21  ;;  %v2747_v32 = vld [vmem:[%s3839_s3 + $0x200] sm:$0xff]   ;;  %v2751_v61 = vld [vmem:[%s3839_s3 + $0x208] sm:$0xff]   ;;  %v2758_v50 = vld [vmem:[%s3839_s3 + $0x2d8] sm:$0xff]  }
  0xad   :  { %v574_v6 = vadd.f32 %v558_v58, %v392_v60  ;;  %v896_v19 = vsel %vm864_vm9, %v848_v51, %v880_v40  ;;  %v560_v0 = vmul.f32 %v541_v10, %v3305_v17  ;;  %v718_v2 = vrot.slane %v638_v15, %v3010_v57  ;;  %v2748_v17 = vld [vmem:[%s3839_s3 + $0x280] sm:$0xff]   ;;  %v2749_v57 = vld [vmem:[%s3839_s3 + $0x248] sm:$0xff]   ;;  %v2773_v25 = vld [vmem:[%s3839_s3 + $0x278] sm:$0xff]  }
  0xae   :  { %2549 = vmatpush3.bf16.msra.mxu0 %v2743_v16  ;;  %v898_v3 = vsel %vm866_vm10, %v850_v29, %v882_v55  ;;  %v907_v12 = vpack.c.bf16 %v891_v18, %v891_v18  ;;  %v909_v21 = vpack.c.bf16 %v893_v30, %v893_v30  ;;  %v394_v56 = vadd.f32 %v378_v27, %v217_v39  ;;  %v2750_v15 = vld [vmem:[%s3839_s3 + $0x2c8] sm:$0xff]   ;;  %v2760_v29 = vld [vmem:[%s3839_s3 + $0x298] sm:$0xff]   ;;  %v2763_v37 = vld [vmem:[%s3839_s3 + $0x220] sm:$0xff]  }
  0xaf   :  { %2571 = vmatpush3.bf16.msra.mxu1 %v2744_v1  ;;  %v3616_v7 = vadd.f32 %v735_v14, %v574_v6  ;;  %2578 = vmatprep.subr.bf16.mxu0 %v2745_v5  ;;  %v912_v4 = vpack.c.bf16 %v896_v19, %v896_v19  ;;  %v818_v41 = vrot.slane %v3887_v20, %v2980_v45  ;;  %v2753_v45 = vld [vmem:[%s3839_s3 + $0x250] sm:$0xff]   ;;  %v2767_v40 = vld [vmem:[%s3839_s3 + $0x228] sm:$0xff]   ;;  %v2775_v18 = vld [vmem:[%s3839_s3 + $0x238] sm:$0xff]  }
  0xb0   :  { %2600 = vmatprep.subr.bf16.mxu1 %v2746_v38  ;;  %v914_v51 = vpack.c.bf16 %v898_v3, %v898_v3  ;;  %v576_v13 = vadd.f32 %v560_v0, %v394_v56  ;;  %v737_v23 = vmul.f32 %v718_v2, %v3309_v22  ;;  %v2754_v22 = vld [vmem:[%s3839_s3 + $0x2d0] sm:$0xff]   ;;  %v794_v54 = vrot.slane %v3887_v20, %v2992_v49  ;;  %v2768_v10 = vld [vmem:[%s3839_s3 + $0x2a8] sm:$0xff]   ;;  %v2776_v5 = vld [vmem:[%s3839_s3 + $0x2b8] sm:$0xff]  }
  0xb1   :  { %2063 = vmatmul.mubr.bf16.vlgmr.msra.gmra.mrb[4].mxu0 %v907_v12  ;;  %v802_v42 = vrot.slane %v3887_v20, %v3000_v53  ;;  %v814_v58 = vrot.slane %v3887_v20, %v2977_v44  ;;  %v2769_v49 = vld [vmem:[%s3839_s3 + $0x270] sm:$0xff]   ;;  %v822_v53 = vrot.slane %v3887_v20, %v2986_v47  ;;  %v2777_v38 = vld [vmem:[%s3839_s3 + $0x340] sm:$0xff]   ;;  %v2781_v12 = vld [vmem:[%s3839_s3 + $0x348] sm:$0xff]  }
  0xb2   :  { %2103 = vmatmul.mubr.bf16.vlgmr.msra.gmra.mrb[4].mxu1 %v909_v21  ;;  %2579 = vmatpush3.bf16.msra.mxu0 %v2747_v32  ;;  %v753_v62 = vadd.f32 %v737_v23, %v576_v13  ;;  %v2770_v16 = vld [vmem:[%s3839_s3 + $0x2f0] sm:$0xff]   ;;  %v847_v44 = vadd.f32 %v794_v54, %v3505_v11  ;;  %v2778_v6 = vld [vmem:[%s3839_s3 + $0x3c0] sm:$0xff]   ;;  %v2789_v23 = vld [vmem:[%s3839_s3 + $0x358] sm:$0xff]  }
  0xb3   :  { %2142 = vmatprep.mubr.bf16.mxu0 %v912_v4  ;;  %2601 = vmatpush3.bf16.msra.mxu1 %v2748_v17  ;;  %v849_v1 = vadd.f32 %v802_v42, %v3552_v26  ;;  %v2771_v55 = vld [vmem:[%s3839_s3 + $0x230] sm:$0xff]   ;;  %v852_v9 = vadd.f32 %v814_v58, %v3577_v52  ;;  %v854_v11 = vadd.f32 %v822_v53, %v3603_v59  ;;  %v2774_v26 = vld [vmem:[%s3839_s3 + $0x2f8] sm:$0xff]   ;;  %v2779_v27 = vld [vmem:[%s3839_s3 + $0x300] sm:$0xff]  }
  0xb4   :  { %2182 = vmatprep.mubr.bf16.mxu1 %v914_v51  ;;  %2580 = vmatprep.subr.bf16.mxu0 %v2749_v57  ;;  %v3642_v34 = vadd.f32 %v818_v41, %v753_v62  ;;  %v2772_v47 = vld [vmem:[%s3839_s3 + $0x2b0] sm:$0xff]   ;;  %v879_v60 = vmul.f32 0.2, %v847_v44  ;;  %vm863_vm11 = vcmp.ge.f32.partialorder %v847_v44, 0.0  ;;  %v2780_v2 = vld [vmem:[%s3839_s3 + $0x380] sm:$0xff]   ;;  %v2782_v17 = vld [vmem:[%s3839_s3 + $0x3c8] sm:$0xff]  }
  0xb5   :  { %2602 = vmatprep.subr.bf16.mxu1 %v2750_v15  ;;  %v881_v52 = vmul.f32 0.2, %v849_v1  ;;  %vm865_vm12 = vcmp.ge.f32.partialorder %v849_v1, 0.0  ;;  %v884_v30 = vmul.f32 0.2, %v852_v9  ;;  %vm868_vm13 = vcmp.ge.f32.partialorder %v852_v9, 0.0 }
  0xb6   :  { %2581 = vmatpush3.bf16.msra.mxu0 %v2751_v61  ;;  %v886_v39 = vmul.f32 0.2, %v854_v11  ;;  %v895_v59 = vsel %vm863_vm11, %v847_v44, %v879_v60  ;;  %vm870_vm14 = vcmp.ge.f32.partialorder %v854_v11, 0.0  ;;  %v2783_v4 = vld [vmem:[%s3839_s3 + $0x308] sm:$0xff]   ;;  %v2785_v15 = vld [vmem:[%s3839_s3 + $0x350] sm:$0xff]   ;;  %v2790_v61 = vld [vmem:[%s3839_s3 + $0x3d8] sm:$0xff]  }
  0xb7   :  { %2603 = vmatpush3.bf16.msra.mxu1 %v2752_v48  ;;  %2582 = vmatprep.subr.bf16.mxu0 %v2753_v45  ;;  %v897_v14 = vsel %vm865_vm12, %v849_v1, %v881_v52  ;;  %v900_v19 = vsel %vm868_vm13, %v852_v9, %v884_v30  ;;  %v911_v0 = vpack.c.bf16 %v895_v59, %v895_v59  ;;  %v2784_v57 = vld [vmem:[%s3839_s3 + $0x388] sm:$0xff]   ;;  %v2786_v41 = vld [vmem:[%s3839_s3 + $0x3d0] sm:$0xff]   ;;  %v2791_v48 = vld [vmem:[%s3839_s3 + $0x318] sm:$0xff]   ;;  %v885_v54 = vmul.f32 0.2, %v3642_v34 }
  0xb8   :  { %2604 = vmatprep.subr.bf16.mxu1 %v2754_v22  ;;  %v902_v32 = vsel %vm870_vm14, %v854_v11, %v886_v39  ;;  %v913_v3 = vpack.c.bf16 %v897_v14, %v897_v14  ;;  %v916_v21 = vpack.c.bf16 %v900_v19, %v900_v19  ;;  %v2787_v51 = vld [vmem:[%s3839_s3 + $0x310] sm:$0xff]   ;;  %v2792_v45 = vld [vmem:[%s3839_s3 + $0x398] sm:$0xff]   ;;  %v2793_v62 = vld [vmem:[%s3839_s3 + $0x360] sm:$0xff]   ;;  %vm869_vm0 = vcmp.ge.f32.partialorder %v3642_v34, 0.0 }
  0xb9   :  { %v918_v56 = vpack.c.bf16 %v902_v32, %v902_v32  ;;  %v2788_v13 = vld [vmem:[%s3839_s3 + $0x390] sm:$0xff]   ;;  %v2794_v22 = vld [vmem:[%s3839_s3 + $0x3e0] sm:$0xff]   ;;  %v2807_v42 = vld [vmem:[%s3839_s3 + $0x338] sm:$0xff]  }
  0xba   :  { %2583 = vmatpush3.bf16.msra.mxu0 %v2755_v24  ;;  %v2795_v24 = vld [vmem:[%s3839_s3 + $0x320] sm:$0xff]   ;;  %v2810_v1 = vld [vmem:[%s3843_s5 + $0x8] sm:$0xff]  }
  0xbb   :  { %2605 = vmatpush3.bf16.msra.mxu1 %v2756_v33  ;;  %2584 = vmatprep.subr.bf16.mxu0 %v2757_v36  ;;  %v2796_v33 = vld [vmem:[%s3839_s3 + $0x3a0] sm:$0xff]   ;;  %v2797_v36 = vld [vmem:[%s3839_s3 + $0x368] sm:$0xff]  }
  0xbc   :  { %2606 = vmatprep.subr.bf16.mxu1 %v2758_v50  ;;  %v2798_v50 = vld [vmem:[%s3839_s3 + $0x3e8] sm:$0xff]   ;;  %v2809_v44 = vld [vmem:[%s3843_s5] sm:$0xff]  }
  0xbe   :  { %2585 = vmatpush3.bf16.msra.mxu0 %v2759_v31  ;;  %v810_v31 = vrot.slane %v3887_v20, %v2974_v43  ;;  %v2802_v43 = vld [vmem:[%s3839_s3 + $0x3f0] sm:$0xff]  }
  0xbf   :  { %2607 = vmatpush3.bf16.msra.mxu1 %v2760_v29  ;;  %2586 = vmatprep.subr.bf16.mxu0 %v2761_v63  ;;  %v2799_v29 = vld [vmem:[%s3839_s3 + $0x328] sm:$0xff]  }
  0xc0   :  { %2608 = vmatprep.subr.bf16.mxu1 %v2762_v28  ;;  %v2800_v63 = vld [vmem:[%s3839_s3 + $0x3a8] sm:$0xff]   ;;  %v2801_v28 = vld [vmem:[%s3839_s3 + $0x370] sm:$0xff]   ;;  %v851_v20 = vadd.f32 %v810_v31, %v3616_v7  ;;  %v2806_v7 = vld [vmem:[%s3839_s3 + $0x3f8] sm:$0xff]  }
  0xc2   :  { %2587 = vmatpush3.bf16.msra.mxu0 %v2763_v37  ;;  %v2803_v37 = vld [vmem:[%s3839_s3 + $0x330] sm:$0xff]   ;;  %vm867_vm15 = vcmp.ge.f32.partialorder %v851_v20, 0.0 }
  0xc3   :  { %2609 = vmatpush3.bf16.msra.mxu1 %v2764_v35  ;;  %2588 = vmatprep.subr.bf16.mxu0 %v2765_v46  ;;  %v2804_v35 = vld [vmem:[%s3839_s3 + $0x3b0] sm:$0xff]   ;;  %v2805_v46 = vld [vmem:[%s3839_s3 + $0x378] sm:$0xff]  }
  0xc4   :  { %2610 = vmatprep.subr.bf16.mxu1 %v2766_v8  ;;  %v883_v8 = vmul.f32 0.2, %v851_v20 }
  0xc6   :  { %2589 = vmatpush3.bf16.msra.mxu0 %v2767_v40  ;;  %v2808_v40 = vld [vmem:[%s3839_s3 + $0x3b8] sm:$0xff]   ;;  %v899_v58 = vsel %vm867_vm15, %v851_v20, %v883_v8 }
  0xc7   :  { %2611 = vmatpush3.bf16.msra.mxu1 %v2768_v10  ;;  %2590 = vmatprep.subr.bf16.mxu0 %v2769_v49  ;;  %v901_v10 = vsel %vm869_vm0, %v3642_v34, %v885_v54  ;;  %v915_v49 = vpack.c.bf16 %v899_v58, %v899_v58  ;;  %v12_v34 = vstv %s3844_s6 }
  0xc8   :  { %2612 = vmatprep.subr.bf16.mxu1 %v2770_v16  ;;  %v917_v53 = vpack.c.bf16 %v901_v10, %v901_v10  ;;  %v2817_v16 = vmov 0.0   ;;  %13 = vst [vmem:[#allocation2] sm:$0x1] %v12_v34 }
  0xca   :  { %2591 = vmatpush3.bf16.msra.mxu0 %v2771_v55 }
  0xcb   :  { %2613 = vmatpush3.bf16.msra.mxu1 %v2772_v47  ;;  %2592 = vmatprep.subr.bf16.mxu0 %v2773_v25  ;;  %v2357_v47 = vld [vmem:[%s3845_s4] ss:$0 sm:$0xff] }
  0xcc   :  { %2614 = vmatprep.subr.bf16.mxu1 %v2774_v26 }
  0xce   :  { %2593 = vmatpush3.bf16.msra.mxu0 %v2775_v18 }
  0xcf   :  { %2615 = vmatpush3.bf16.msra.mxu1 %v2776_v5  ;;  %2622 = vmatprep.subr.bf16.mxu0 %v2777_v38  ;;  %v2486_v8 = vld [vmem:[#allocation2] ss:$0 sm:$0xff] }
  0xd0   :  { %2644 = vmatprep.subr.bf16.mxu1 %v2778_v6 }
  0xd1   :  { %2143 = vmatmul.mubr.bf16.vlgmr.msra.gmra.mrb[8].mxu0 %v911_v0 }
  0xd2   :  { %2183 = vmatmul.mubr.bf16.vlgmr.msra.gmra.mrb[8].mxu1 %v913_v3  ;;  %2623 = vmatpush3.bf16.msra.mxu0 %v2779_v27 }
  0xd3   :  { %2222 = vmatprep.mubr.bf16.mxu0 %v916_v21  ;;  %2645 = vmatpush3.bf16.msra.mxu1 %v2780_v2 }
  0xd4   :  { %2262 = vmatprep.mubr.bf16.mxu1 %v918_v56  ;;  %2624 = vmatprep.subr.bf16.mxu0 %v2781_v12 }
  0xd5   :  { %2646 = vmatprep.subr.bf16.mxu1 %v2782_v17 }
  0xd6   :  { %2625 = vmatpush3.bf16.msra.mxu0 %v2783_v4 }
  0xd7   :  { %2647 = vmatpush3.bf16.msra.mxu1 %v2784_v57  ;;  %2626 = vmatprep.subr.bf16.mxu0 %v2785_v15 }
  0xd8   :  { %2648 = vmatprep.subr.bf16.mxu1 %v2786_v41 }
  0xda   :  { %2627 = vmatpush3.bf16.msra.mxu0 %v2787_v51 }
  0xdb   :  { %2649 = vmatpush3.bf16.msra.mxu1 %v2788_v13  ;;  %2628 = vmatprep.subr.bf16.mxu0 %v2789_v23 }
  0xdc   :  { %2650 = vmatprep.subr.bf16.mxu1 %v2790_v61 }
  0xde   :  { %2629 = vmatpush3.bf16.msra.mxu0 %v2791_v48 }
  0xdf   :  { %2651 = vmatpush3.bf16.msra.mxu1 %v2792_v45  ;;  %2630 = vmatprep.subr.bf16.mxu0 %v2793_v62 }
  0xe0   :  { %2652 = vmatprep.subr.bf16.mxu1 %v2794_v22 }
  0xe2   :  { %2631 = vmatpush3.bf16.msra.mxu0 %v2795_v24 }
  0xe3   :  { %2653 = vmatpush3.bf16.msra.mxu1 %v2796_v33  ;;  %2632 = vmatprep.subr.bf16.mxu0 %v2797_v36 }
  0xe4   :  { %2654 = vmatprep.subr.bf16.mxu1 %v2798_v50 }
  0xe6   :  { %2633 = vmatpush3.bf16.msra.mxu0 %v2799_v29 }
  0xe7   :  { %2655 = vmatpush3.bf16.msra.mxu1 %v2800_v63  ;;  %2634 = vmatprep.subr.bf16.mxu0 %v2801_v28 }
  0xe8   :  { %2656 = vmatprep.subr.bf16.mxu1 %v2802_v43 }
  0xea   :  { %2635 = vmatpush3.bf16.msra.mxu0 %v2803_v37 }
  0xeb   :  { %2657 = vmatpush3.bf16.msra.mxu1 %v2804_v35  ;;  %2636 = vmatprep.subr.bf16.mxu0 %v2805_v46 }
  0xec   :  { %2658 = vmatprep.subr.bf16.mxu1 %v2806_v7 }
  0xee   :  { %2637 = vmatpush3.bf16.msra.mxu0 %v2807_v42 }
  0xef   :  { %2659 = vmatpush3.bf16.msra.mxu1 %v2808_v40  ;;  %2669 = vmatprep.subr.bf16.mxu0 %v2817_v16 }
  0xf1   :  { %2223 = vmatmul.mubr.bf16.vlgmr.msra.gmra.mrb[12].mxu0 %v915_v49 }
  0xf2   :  { %2263 = vmatmul.mubr.bf16.vlgmr.msra.gmra.mrb[12].mxu1 %v917_v53  ;;  %2673 = vmatprep.mubr.msk.bf16.mxu0 %vm2818_vm1, %v2817_v16 }
  0xf3   :  { %2670 = vmatpush3.bf16.msra.mxu0 %v2809_v44 }
  0xf4   :  { %2671 = vmatprep.subr.bf16.mxu0 %v2817_v16 }
  0xf7   :  { %2672 = vmatpush3.bf16.msra.mxu0 %v2810_v1 }
 0x164   :  { %v2506_v55 = vpop.f32.mrb[0].mxu0  ;;  %v2528_v9 = vpop.f32.mrb[0].mxu1 }
 0x165   :  { %v2507_v25 = vpop.f32.mrb[1].mxu0  ;;  %v2529_v11 = vpop.f32.mrb[1].mxu1 }
 0x166   :  { %v2508_v26 = vadd.f32 %v2507_v25, %v2506_v55  ;;  %v2530_v60 = vadd.f32 %v2529_v11, %v2528_v9  ;;  %v2509_v52 = vpop.f32.mrb[2].mxu0  ;;  %v2531_v18 = vpop.f32.mrb[2].mxu1 }
 0x167   :  { %v2510_v30 = vpop.f32.mrb[3].mxu0  ;;  %v2532_v5 = vpop.f32.mrb[3].mxu1 }
 0x168   :  { %v1985_v38 = vadd.f32 %v2508_v26, %v2357_v47 }
 0x16a   :  { %v2025_v39 = vadd.f32 %v2530_v60, %v1985_v38 }
 0x184   :  { %v2550_v59 = vpop.f32.mrb[4].mxu0 }
 0x185   :  { %v2572_v6 = vpop.f32.mrb[4].mxu1  ;;  %v2551_v14 = vpop.f32.mrb[5].mxu0 }
 0x186   :  { %v2573_v27 = vpop.f32.mrb[5].mxu1  ;;  %v2552_v19 = vadd.f32 %v2551_v14, %v2550_v59  ;;  %v2553_v2 = vpop.f32.mrb[6].mxu0 }
 0x187   :  { %v2574_v0 = vadd.f32 %v2573_v27, %v2572_v6  ;;  %v2575_v32 = vpop.f32.mrb[6].mxu1  ;;  %v2554_v3 = vpop.f32.mrb[7].mxu0 }
 0x188   :  { %v2576_v12 = vpop.f32.mrb[7].mxu1  ;;  %v2065_v21 = vadd.f32 %v2552_v19, %v2025_v39 }
 0x18a   :  { %v2105_v17 = vadd.f32 %v2574_v0, %v2065_v21 }
 0x1a4   :  { %v2594_v56 = vpop.f32.mrb[8].mxu0 }
 0x1a5   :  { %v2616_v4 = vpop.f32.mrb[8].mxu1  ;;  %v2595_v57 = vpop.f32.mrb[9].mxu0 }
 0x1a6   :  { %v2596_v15 = vadd.f32 %v2595_v57, %v2594_v56  ;;  %v2617_v41 = vpop.f32.mrb[9].mxu1  ;;  %v2597_v51 = vpop.f32.mrb[10].mxu0 }
 0x1a7   :  { %v2618_v13 = vadd.f32 %v2617_v41, %v2616_v4  ;;  %v2619_v23 = vpop.f32.mrb[10].mxu1  ;;  %v2598_v61 = vpop.f32.mrb[11].mxu0 }
 0x1a8   :  { %v2145_v48 = vadd.f32 %v2596_v15, %v2105_v17  ;;  %v2620_v45 = vpop.f32.mrb[11].mxu1 }
 0x1aa   :  { %v2185_v62 = vadd.f32 %v2618_v13, %v2145_v48 }
 0x1c4   :  { %v2638_v22 = vpop.f32.mrb[12].mxu0 }
 0x1c5   :  { %v2660_v24 = vpop.f32.mrb[12].mxu1  ;;  %v2639_v33 = vpop.f32.mrb[13].mxu0 }
 0x1c6   :  { %v2640_v36 = vadd.f32 %v2639_v33, %v2638_v22  ;;  %v2661_v50 = vpop.f32.mrb[13].mxu1  ;;  %v2641_v31 = vpop.f32.mrb[14].mxu0 }
 0x1c7   :  { %v2662_v29 = vadd.f32 %v2661_v50, %v2660_v24  ;;  %v2663_v63 = vpop.f32.mrb[14].mxu1  ;;  %v2642_v28 = vpop.f32.mrb[15].mxu0 }
 0x1c8   :  { %v2225_v43 = vadd.f32 %v2640_v36, %v2185_v62  ;;  %v2664_v20 = vpop.f32.mrb[15].mxu1 }
 0x1ca   :  { %v2265_v37 = vadd.f32 %v2662_v29, %v2225_v43 }
 0x1cc   :  { %vm2270_vm2 = vcmp.ge.f32.partialorder %v2265_v37, 0.0  ;;  %v2271_v35 = vmul.f32 0.2, %v2265_v37 }
 0x1ce   :  { %v2272_v46 = vsel %vm2270_vm2, %v2265_v37, %v2271_v35 }
 0x1cf   :  { %v2273_v7 = vpack.c.bf16 %v2272_v46, %v2272_v46 }
 0x1d1   :  { %2674 = vmatmul.mubr.msk.bf16.vlgmr.msra.gmra.mrb[16].mxu0 %vm2297_vm3, %v2273_v7 }
 0x2a4   :  { %v2335_v54 = vpop.f32.mrb[16].mxu0 }
 0x2a5   :  { %v2336_v42 = vadd.f32 %v2486_v8, %v2335_v54  ;;  %v2675_v40 = vpop.f32.mrb[17].mxu0 }
 0x2a6   :  { %v2338_v58 = vpop.f32.mrb[18].mxu0 }
 0x2a7   :  { %v2341_v10 = vand.u32 2147483647, %v2336_v42  ;;  %v2676_v49 = vpop.f32.mrb[19].mxu0  ;;  %vm2345_vm5 = vcmp.ge.f32.partialorder %v2336_v42, 0.0 }
 0x2a9   :  { %v2342_v53 = vsub.f32 0.0, %v2341_v10 }
 0x2ab   :  { %v2343_v16 = vmul.f32 1.442695, %v2342_v53 }
 0x2ad   :  { %2811 = vpow2.f32 %v2343_v16 }
 0x2b7   :  { %v2812_v44 = vpop.eup %2811 }
 0x2b8   :  { %v2346_v1 = vadd.f32 1.0, %v2812_v44 }
 0x2ba   :  { %2813 = vrcp.f32 %v2346_v1 }
 0x2c4   :  { %v2814_v34 = vpop.eup %2813 }
 0x2c5   :  { %v2349_v55 = vmul.f32 %v2814_v34, %v2812_v44 }
 0x2c7   :  { %v2350_v9 = vsel %vm2345_vm5, %v2814_v34, %v2349_v55 }
 0x2c8   :  { %2352 = vst.msk [vmem:[%s3846_s7] sm:$0x3] %vm2351_vm4, %v2350_v9 }

</bundles_post_ra>
